<compile_context>
chip_gen: v6e
topology: v6e:2x2x1
jax: 0.10.0
libtpu: 0.0.40
codegen_flags: <defaults>
</compile_context>

<pallas_src>
import functools

import jax
import jax.numpy as jnp
import numpy as np
from jax.experimental import pallas as pl
from jax.experimental.pallas import tpu as pltpu

_LN_EPS = 1e-5  # PyTorch nn.LayerNorm default
_MAX_VMEM_BUDGET = 48 * 1024 * 1024  # safe on v5e/v6e (128 MiB) and v7x (64 MiB)


# ------------------------------- small helpers -------------------------------
def _round_up(n, m):
    return ((n + m - 1) // m) * m


def _sublanes(dtype):
    # packed sublane multiple per element width: f32 -> 8, bf16 -> 16, int8/fp8 -> 32
    return {4: 8, 2: 16, 1: 32}.get(np.dtype(dtype).itemsize, 8)


def _vmem_budget_bytes():
    """Conservative per-kernel VMEM budget, also used as vmem_limit_bytes."""
    try:
        cap = int(pltpu.get_tpu_info().vmem_capacity_bytes)
    except Exception:  # pragma: no cover - older jax / non-TPU tracing
        cap = 128 * 1024 * 1024
    return min(max(cap // 2 - (8 << 20), 16 << 20), _MAX_VMEM_BUDGET)


def _ln_rows(x_f32, gamma_row, beta_row):
    """LayerNorm over the last (lane) axis, PyTorch semantics, f32 math.

    One-pass statistics (sum and sum-of-squares together) — one fewer dependent
    cross-lane XLU reduction on the critical path; variance clamped at 0.
    """
    inv_n = 1.0 / x_f32.shape[-1]
    s1 = jnp.sum(x_f32, axis=-1, keepdims=True)
    s2 = jnp.sum(x_f32 * x_f32, axis=-1, keepdims=True)
    mean = s1 * inv_n
    var = jnp.maximum(s2 * inv_n - mean * mean, 0.0)  # biased var, like nn.LayerNorm
    return (x_f32 - mean) * jax.lax.rsqrt(var + _LN_EPS) * gamma_row + beta_row


# ---------------------------- tile-size derivation ----------------------------
def _choose_ln_tile(rows, d, in_bytes, out_bytes, row_tile, sub, budget):
    tm = max(sub, min(_round_up(row_tile, sub), _round_up(rows, sub)))

    def footprint(t):
        # in + out blocks, double-buffered, plus gamma/beta
        return 2 * t * d * (in_bytes + out_bytes) + 4 * d * 4

    while footprint(tm) > budget and tm > sub:
        tm = max(sub, _round_up(tm // 2, sub))
    return tm


def _choose_fused_tiles(m, dim, ctx_dim, n_pad, in_bytes, w_bytes, out_bytes,
                        row_tile, sub, budget):
    k = dim + ctx_dim
    # N tile candidates: multiples of 128 that divide n_pad, largest first
    # (tn == n_pad => single N block => weights stay VMEM-resident across the grid).
    tn_cands = [t for t in range(n_pad, 127, -128) if n_pad % t == 0]

    def footprint(tm, tn):
        act = 2 * tm * k * in_bytes              # x + context row blocks (double-buffered)
        wgt = 2 * (k * tn * w_bytes + tn * 4)    # [Wx;Wc] + bias (double-buffered)
        out = 2 * tm * tn * out_bytes            # output block (double-buffered)
        scr = tm * k * 4                         # LN cache scratch (single buffer, f32)
        par = 4 * k * 4                          # gammas / betas
        return act + wgt + out + scr + par

    tm = max(sub, min(_round_up(row_tile, sub), _round_up(m, sub)))
    while True:
        for tn in tn_cands:
            if footprint(tm, tn) <= budget:
                return tm, tn
        smaller = max(sub, _round_up(tm // 2, sub))
        if smaller == tm:
            return tm, tn_cands[-1]
        tm = smaller


# ----------------------------- standalone LayerNorm ---------------------------
def _layernorm_kernel(x_ref, g_ref, b_ref, o_ref):
    y = _ln_rows(x_ref[...].astype(jnp.float32), g_ref[...], b_ref[...])
    o_ref[...] = y.astype(o_ref.dtype)


def layer_norm_pallas(x, gamma, beta, *, row_tile=512, out_dtype=None):
    """LayerNorm over the last axis of x (any leading dims). No wrapper-side padding."""
    orig_shape = x.shape
    d = orig_shape[-1]
    x2d = x.reshape(-1, d)
    rows = x2d.shape[0]
    out_dtype = x.dtype if out_dtype is None else out_dtype

    sub = _sublanes(x.dtype)
    budget = _vmem_budget_bytes()
    tm = _choose_ln_tile(rows, d, np.dtype(x.dtype).itemsize,
                         np.dtype(out_dtype).itemsize, row_tile, sub, budget)

    g2d = gamma.reshape(1, d).astype(jnp.float32)
    b2d = beta.reshape(1, d).astype(jnp.float32)

    out = pl.pallas_call(
        _layernorm_kernel,
        out_shape=jax.ShapeDtypeStruct((rows, d), out_dtype),
        grid_spec=pltpu.PrefetchScalarGridSpec(
            num_scalar_prefetch=0,
            grid=(pl.cdiv(rows, tm),),
            in_specs=[
                pl.BlockSpec((tm, d), lambda i: (i, 0)),
                pl.BlockSpec((1, d), lambda i: (0, 0)),
                pl.BlockSpec((1, d), lambda i: (0, 0)),
            ],
            out_specs=pl.BlockSpec((tm, d), lambda i: (i, 0)),
        ),
        compiler_params=pltpu.CompilerParams(
            dimension_semantics=("parallel",),
            vmem_limit_bytes=int(budget)),
    )(x2d, g2d, b2d)

    return out.reshape(orig_shape)


# -------------------- fused PreNorm + cross-linear (one kernel) ---------------
def _fused_prenorm_cross_kernel(x_ref, c_ref, gx_ref, bx_ref, gc_ref, bc_ref,
                                w_ref, bias_ref, o_ref, xc_scratch,
                                *, ln_x, ln_c, matmul_dtype, precision):
    # LN prologue runs once per row tile (j == 0); the normalized, lane-concatenated
    # activations are cached in VMEM scratch and reused for every N tile.
    @pl.when(pl.program_id(1) == 0)
    def _():
        xn = x_ref[...].astype(jnp.float32)
        if ln_x:
            xn = _ln_rows(xn, gx_ref[...], bx_ref[...])
        cn = c_ref[...].astype(jnp.float32)
        if ln_c:
            cn = _ln_rows(cn, gc_ref[...], bc_ref[...])
        xc_scratch[...] = jnp.concatenate([xn, cn], axis=-1)

    acc = jnp.dot(xc_scratch[...].astype(matmul_dtype), w_ref[...],
                  preferred_element_type=jnp.float32, precision=precision)
    o_ref[...] = (acc + bias_ref[...]).astype(o_ref.dtype)


def prenorm_cross_linear_pallas(x, context, wx, wc, bias, *,
                                ln_x=None, ln_c=None,
                                row_tile=256,
                                matmul_dtype=jnp.bfloat16,
                                out_dtype=None):
    """out = LN?(x) @ wx + LN?(context) @ wc + bias, fused in a single pallas_call.

    ln_x / ln_c are (gamma, beta) tuples or None (skip that LayerNorm).
    matmul_dtype=float32 gives exact-parity MXU math (Precision.HIGHEST).
    """
    lead = x.shape[:-1]
    dim = x.shape[-1]
    ctx_dim = context.shape[-1]
    d_out = wx.shape[-1]
    assert context.shape[:-1] == lead, "x and context must share leading dims"
    out_dtype = x.dtype if out_dtype is None else out_dtype
    matmul_dtype = np.dtype(matmul_dtype)

    m = int(np.prod(lead)) if lead else 1
    x2d = x.reshape(m, dim)
    c2d = context.reshape(m, ctx_dim)

    # Fused K: concatenate [Wx; Wc] once (wrapper/init-time).  Lane-dense output: pad
    # d_out up to a multiple of 128 (zero weight/bias columns, sliced off below).
    n_pad = _round_up(d_out, 128)
    w_cat = jnp.concatenate([wx, wc], axis=0)                                  # (K, d_out)
    w_cat = jnp.pad(w_cat, ((0, 0), (0, n_pad - d_out))).astype(matmul_dtype)  # (K, n_pad)
    bias_p = jnp.pad(bias.reshape(-1), (0, n_pad - d_out)
                     ).astype(jnp.float32).reshape(1, n_pad)

    gx, bx = ln_x if ln_x is not None else (jnp.ones((dim,), jnp.float32),
                                            jnp.zeros((dim,), jnp.float32))
    gc, bc = ln_c if ln_c is not None else (jnp.ones((ctx_dim,), jnp.float32),
                                            jnp.zeros((ctx_dim,), jnp.float32))
    gx = gx.reshape(1, dim).astype(jnp.float32)
    bx = bx.reshape(1, dim).astype(jnp.float32)
    gc = gc.reshape(1, ctx_dim).astype(jnp.float32)
    bc = bc.reshape(1, ctx_dim).astype(jnp.float32)

    sub = _sublanes(x.dtype)
    budget = _vmem_budget_bytes()
    tm, tn = _choose_fused_tiles(m, dim, ctx_dim, n_pad,
                                 in_bytes=np.dtype(x.dtype).itemsize,
                                 w_bytes=matmul_dtype.itemsize,
                                 out_bytes=np.dtype(out_dtype).itemsize,
                                 row_tile=row_tile, sub=sub, budget=budget)

    precision = (jax.lax.Precision.HIGHEST
                 if matmul_dtype == np.dtype(jnp.float32) else None)
    kernel = functools.partial(_fused_prenorm_cross_kernel,
                               ln_x=ln_x is not None,
                               ln_c=ln_c is not None,
                               matmul_dtype=matmul_dtype,
                               precision=precision)

    out = pl.pallas_call(
        kernel,
        out_shape=jax.ShapeDtypeStruct((m, n_pad), out_dtype),
        grid_spec=pltpu.PrefetchScalarGridSpec(
            num_scalar_prefetch=0,
            grid=(pl.cdiv(m, tm), n_pad // tn),
            in_specs=[
                pl.BlockSpec((tm, dim), lambda i, j: (i, 0)),            # x rows
                pl.BlockSpec((tm, ctx_dim), lambda i, j: (i, 0)),        # context rows
                pl.BlockSpec((1, dim), lambda i, j: (0, 0)),             # gamma_x
                pl.BlockSpec((1, dim), lambda i, j: (0, 0)),             # beta_x
                pl.BlockSpec((1, ctx_dim), lambda i, j: (0, 0)),         # gamma_c
                pl.BlockSpec((1, ctx_dim), lambda i, j: (0, 0)),         # beta_c
                pl.BlockSpec((dim + ctx_dim, tn), lambda i, j: (0, j)),  # [Wx; Wc]
                pl.BlockSpec((1, tn), lambda i, j: (0, j)),              # bias
            ],
            out_specs=pl.BlockSpec((tm, tn), lambda i, j: (i, j)),
            scratch_shapes=[pltpu.VMEM((tm, dim + ctx_dim), jnp.float32)],
        ),
        compiler_params=pltpu.CompilerParams(
            dimension_semantics=("parallel", "arbitrary"),
            vmem_limit_bytes=int(budget)),
    )(x2d, c2d, gx, bx, gc, bc, w_cat, bias_p)

    out = out[:, :d_out]
    return out.reshape(*lead, d_out)


# --------------------------------- module port --------------------------------
class CrossLinear:
    """Deterministic demo `fn`: fn(x, context) = x @ Wx + context @ Wc + b (Pallas matmul)."""

    def __init__(self, wx, wc, bias):
        self.wx, self.wc, self.bias = wx, wc, bias

    def __call__(self, x, context):
        # no LayerNorm inside fn itself
        return prenorm_cross_linear_pallas(x, context, self.wx, self.wc, self.bias)


class PreNormPallas:
    """Pallas port of PreNorm: x = LN(x); context = LN(context) if configured; return fn(x, **kwargs)."""

    def __init__(self, dim, fn, context_dim=None):
        self.fn = fn
        # nn.LayerNorm init: weight = ones, bias = zeros
        self.gamma = jnp.ones((dim,), jnp.float32)
        self.beta = jnp.zeros((dim,), jnp.float32)
        self.has_context_norm = context_dim is not None
        if self.has_context_norm:
            self.gamma_c = jnp.ones((context_dim,), jnp.float32)
            self.beta_c = jnp.zeros((context_dim,), jnp.float32)

    def __call__(self, x, **kwargs):
        # Fast path: when fn is the cross-linear head, fuse both LayerNorms with the
        # matmul in a single kernel (no HBM round trip for the normalized activations).
        if isinstance(self.fn, CrossLinear) and set(kwargs) == {"context"}:
            ln_c = (self.gamma_c, self.beta_c) if self.has_context_norm else None
            return prenorm_cross_linear_pallas(
                x, kwargs["context"], self.fn.wx, self.fn.wc, self.fn.bias,
                ln_x=(self.gamma, self.beta), ln_c=ln_c)
        # Generic path: standalone tiled LayerNorm kernels, then the arbitrary fn.
        # TODO(synk): arbitrary user fns cannot be fused in-kernel; they run as plain JAX.
        x = layer_norm_pallas(x, self.gamma, self.beta)
        if self.has_context_norm and "context" in kwargs:
            normed_context = layer_norm_pallas(kwargs["context"], self.gamma_c, self.beta_c)
            kwargs = dict(kwargs, context=normed_context)
        return self.fn(x, **kwargs)


# ------------------------------ pure-JAX reference ----------------------------
def _ln_ref(x, gamma, beta):
    m = jnp.mean(x, axis=-1, keepdims=True)
    v = jnp.mean((x - m) ** 2, axis=-1, keepdims=True)
    return (x - m) * jax.lax.rsqrt(v + _LN_EPS) * gamma + beta


if __name__ == "__main__":
    B, S, DIM, CTX_DIM, D_OUT = 2, 8, 32, 16, 32

    key = jax.random.PRNGKey(0)
    kx, kc, kwx, kwc = jax.random.split(key, 4)
    x = jax.random.normal(kx, (B, S, DIM), jnp.float32)
    context = jax.random.normal(kc, (B, S, CTX_DIM), jnp.float32)

    # deterministic fn parameters
    wx = jax.random.normal(kwx, (DIM, D_OUT), jnp.float32) * 0.05
    wc = jax.random.normal(kwc, (CTX_DIM, D_OUT), jnp.float32) * 0.05
    bias = jnp.zeros((D_OUT,), jnp.float32)

    fn = CrossLinear(wx, wc, bias)
    prenorm = PreNormPallas(DIM, fn, context_dim=CTX_DIM)
    out = jax.block_until_ready(prenorm(x, context=context))   # fused path

    # plain-JAX reference (f32 everywhere)
    xn_ref = _ln_ref(x, prenorm.gamma, prenorm.beta)
    cn_ref = _ln_ref(context, prenorm.gamma_c, prenorm.beta_c)
    ref = xn_ref @ wx + cn_ref @ wc + bias

    # fused kernel feeds bf16 operands to the MXU (f32 accumulation) -> bf16-level tolerance
    np.testing.assert_allclose(np.asarray(out), np.asarray(ref), rtol=2e-2, atol=2e-2)

    # standalone LayerNorm kernel (used by the generic-fn path), f32 one-pass stats
    ln_out = jax.block_until_ready(layer_norm_pallas(x, prenorm.gamma, prenorm.beta))
    np.testing.assert_allclose(np.asarray(ln_out), np.asarray(xn_ref), rtol=1e-4, atol=1e-5)

    # generic path through the class with an arbitrary pure-JAX fn
    pn_generic = PreNormPallas(
        DIM, lambda x, context: x @ wx + context @ wc + bias, context_dim=CTX_DIM)
    out_generic = jax.block_until_ready(pn_generic(x, context=context))
    np.testing.assert_allclose(np.asarray(out_generic), np.asarray(ref), rtol=1e-4, atol=1e-4)

    print("KERNEL_OK")
</pallas_src>

<mosaic_0001>
module attributes {stable_mosaic.version = 11 : i64} {
  func.func @_fused_prenorm_cross_kernel(%arg0: i32, %arg1: i32, %arg2: memref<16x32xf32, #tpu.memory_space<vmem>>, %arg3: memref<16x16xf32, #tpu.memory_space<vmem>>, %arg4: memref<1x32xf32, #tpu.memory_space<vmem>>, %arg5: memref<1x32xf32, #tpu.memory_space<vmem>>, %arg6: memref<1x16xf32, #tpu.memory_space<vmem>>, %arg7: memref<1x16xf32, #tpu.memory_space<vmem>>, %arg8: memref<48x128xbf16, #tpu.memory_space<vmem>>, %arg9: memref<1x128xf32, #tpu.memory_space<vmem>>, %arg10: memref<16x128xf32, #tpu.memory_space<vmem>>, %arg11: memref<16x48xf32, #tpu.memory_space<vmem>>) attributes {dimension_semantics = [#tpu.dimension_semantics<parallel>, #tpu.dimension_semantics<arbitrary>], iteration_bounds = array<i64: 1, 1>, scalar_prefetch = 0 : i64, scratch_operands = 1 : i64, tpu.core_type = #tpu.core_type<tc>, window_params = [{transform_indices = @transform_0, window_bounds = array<i64: 16, 32>}, {transform_indices = @transform_1, window_bounds = array<i64: 16, 16>}, {pipeline_mode = #tpu.pipeline_mode<synchronous>, transform_indices = @transform_2, window_bounds = array<i64: 1, 32>}, {pipeline_mode = #tpu.pipeline_mode<synchronous>, transform_indices = @transform_3, window_bounds = array<i64: 1, 32>}, {pipeline_mode = #tpu.pipeline_mode<synchronous>, transform_indices = @transform_4, window_bounds = array<i64: 1, 16>}, {pipeline_mode = #tpu.pipeline_mode<synchronous>, transform_indices = @transform_5, window_bounds = array<i64: 1, 16>}, {transform_indices = @transform_6, window_bounds = array<i64: 48, 128>}, {transform_indices = @transform_7, window_bounds = array<i64: 1, 128>}, {transform_indices = @transform_8, window_bounds = array<i64: 16, 128>}]} {
    %c0_i32 = arith.constant 0 : i32
    %0 = arith.cmpi eq, %arg1, %c0_i32 : i32
    %1 = arith.extui %0 : i1 to i32
    %c0_i32_0 = arith.constant 0 : i32
    %2 = arith.cmpi ne, %1, %c0_i32_0 : i32
    scf.if %2 {
      %c0_8 = arith.constant 0 : index
      %c0_9 = arith.constant 0 : index
      %11 = vector.load %arg2[%c0_8, %c0_9] : memref<16x32xf32, #tpu.memory_space<vmem>>, vector<16x32xf32>
      %c0_10 = arith.constant 0 : index
      %c0_11 = arith.constant 0 : index
      %12 = vector.load %arg4[%c0_10, %c0_11] : memref<1x32xf32, #tpu.memory_space<vmem>>, vector<1x32xf32>
      %c0_12 = arith.constant 0 : index
      %c0_13 = arith.constant 0 : index
      %13 = vector.load %arg5[%c0_12, %c0_13] : memref<1x32xf32, #tpu.memory_space<vmem>>, vector<1x32xf32>
      %cst_14 = arith.constant dense<0.000000e+00> : vector<16xf32>
      %14 = vector.multi_reduction <add>, %11, %cst_14 [1] : vector<16x32xf32> to vector<16xf32>
      %15 = vector.shape_cast %14 : vector<16xf32> to vector<16x1xf32>
      %16 = arith.mulf %11, %11 : vector<16x32xf32>
      %cst_15 = arith.constant dense<0.000000e+00> : vector<16xf32>
      %17 = vector.multi_reduction <add>, %16, %cst_15 [1] : vector<16x32xf32> to vector<16xf32>
      %18 = vector.shape_cast %17 : vector<16xf32> to vector<16x1xf32>
      %cst_16 = arith.constant 3.125000e-02 : f32
      %19 = vector.broadcast %cst_16 : f32 to vector<16x1xf32>
      %20 = arith.mulf %15, %19 : vector<16x1xf32>
      %cst_17 = arith.constant 3.125000e-02 : f32
      %21 = vector.broadcast %cst_17 : f32 to vector<16x1xf32>
      %22 = arith.mulf %18, %21 : vector<16x1xf32>
      %23 = arith.mulf %20, %20 : vector<16x1xf32>
      %24 = arith.subf %22, %23 : vector<16x1xf32>
      %cst_18 = arith.constant 0.000000e+00 : f32
      %25 = vector.broadcast %cst_18 : f32 to vector<16x1xf32>
      %26 = arith.maximumf %24, %25 : vector<16x1xf32>
      %27 = vector.broadcast %20 : vector<16x1xf32> to vector<16x32xf32>
      %28 = arith.subf %11, %27 : vector<16x32xf32>
      %cst_19 = arith.constant 9.99999974E-6 : f32
      %29 = vector.broadcast %cst_19 : f32 to vector<16x1xf32>
      %30 = arith.addf %26, %29 : vector<16x1xf32>
      %31 = math.rsqrt %30 : vector<16x1xf32>
      %32 = vector.broadcast %31 : vector<16x1xf32> to vector<16x32xf32>
      %33 = arith.mulf %28, %32 : vector<16x32xf32>
      %34 = vector.broadcast %12 : vector<1x32xf32> to vector<16x32xf32>
      %35 = arith.mulf %33, %34 : vector<16x32xf32>
      %36 = vector.broadcast %13 : vector<1x32xf32> to vector<16x32xf32>
      %37 = arith.addf %35, %36 : vector<16x32xf32>
      %c0_20 = arith.constant 0 : index
      %c0_21 = arith.constant 0 : index
      %38 = vector.load %arg3[%c0_20, %c0_21] : memref<16x16xf32, #tpu.memory_space<vmem>>, vector<16x16xf32>
      %c0_22 = arith.constant 0 : index
      %c0_23 = arith.constant 0 : index
      %39 = vector.load %arg6[%c0_22, %c0_23] : memref<1x16xf32, #tpu.memory_space<vmem>>, vector<1x16xf32>
      %c0_24 = arith.constant 0 : index
      %c0_25 = arith.constant 0 : index
      %40 = vector.load %arg7[%c0_24, %c0_25] : memref<1x16xf32, #tpu.memory_space<vmem>>, vector<1x16xf32>
      %cst_26 = arith.constant dense<0.000000e+00> : vector<16xf32>
      %41 = vector.multi_reduction <add>, %38, %cst_26 [1] : vector<16x16xf32> to vector<16xf32>
      %42 = vector.shape_cast %41 : vector<16xf32> to vector<16x1xf32>
      %43 = arith.mulf %38, %38 : vector<16x16xf32>
      %cst_27 = arith.constant dense<0.000000e+00> : vector<16xf32>
      %44 = vector.multi_reduction <add>, %43, %cst_27 [1] : vector<16x16xf32> to vector<16xf32>
      %45 = vector.shape_cast %44 : vector<16xf32> to vector<16x1xf32>
      %cst_28 = arith.constant 6.250000e-02 : f32
      %46 = vector.broadcast %cst_28 : f32 to vector<16x1xf32>
      %47 = arith.mulf %42, %46 : vector<16x1xf32>
      %cst_29 = arith.constant 6.250000e-02 : f32
      %48 = vector.broadcast %cst_29 : f32 to vector<16x1xf32>
      %49 = arith.mulf %45, %48 : vector<16x1xf32>
      %50 = arith.mulf %47, %47 : vector<16x1xf32>
      %51 = arith.subf %49, %50 : vector<16x1xf32>
      %cst_30 = arith.constant 0.000000e+00 : f32
      %52 = vector.broadcast %cst_30 : f32 to vector<16x1xf32>
      %53 = arith.maximumf %51, %52 : vector<16x1xf32>
      %54 = vector.broadcast %47 : vector<16x1xf32> to vector<16x16xf32>
      %55 = arith.subf %38, %54 : vector<16x16xf32>
      %cst_31 = arith.constant 9.99999974E-6 : f32
      %56 = vector.broadcast %cst_31 : f32 to vector<16x1xf32>
      %57 = arith.addf %53, %56 : vector<16x1xf32>
      %58 = math.rsqrt %57 : vector<16x1xf32>
      %59 = vector.broadcast %58 : vector<16x1xf32> to vector<16x16xf32>
      %60 = arith.mulf %55, %59 : vector<16x16xf32>
      %61 = vector.broadcast %39 : vector<1x16xf32> to vector<16x16xf32>
      %62 = arith.mulf %60, %61 : vector<16x16xf32>
      %63 = vector.broadcast %40 : vector<1x16xf32> to vector<16x16xf32>
      %64 = arith.addf %62, %63 : vector<16x16xf32>
      %65 = tpu.concatenate %37, %64 in 1 : vector<16x32xf32>, vector<16x16xf32> -> vector<16x48xf32>
      %c0_32 = arith.constant 0 : index
      %c0_33 = arith.constant 0 : index
      %66 = vector.load %arg11[%c0_32, %c0_33] : memref<16x48xf32, #tpu.memory_space<vmem>>, vector<16x48xf32>
      tpu.vector_store %arg11[%c0_32, %c0_33], %65 {strides = array<i32>} : memref<16x48xf32, #tpu.memory_space<vmem>>, vector<16x48xf32>,
    } else {
    }
    %c0 = arith.constant 0 : index
    %c0_1 = arith.constant 0 : index
    %3 = vector.load %arg11[%c0, %c0_1] : memref<16x48xf32, #tpu.memory_space<vmem>>, vector<16x48xf32>
    %4 = arith.truncf %3 : vector<16x48xf32> to vector<16x48xbf16>
    %c0_2 = arith.constant 0 : index
    %c0_3 = arith.constant 0 : index
    %5 = vector.load %arg8[%c0_2, %c0_3] : memref<48x128xbf16, #tpu.memory_space<vmem>>, vector<48x128xbf16>
    %cst = arith.constant dense<0.000000e+00> : vector<16x128xf32>
    %6 = tpu.matmul %4, %5, %cst {dimension_numbers = #tpu.dot_dimension_numbers<[1], [0], [0], [1], [0, 0, 1, 1], [], []>} : vector<16x48xbf16>, vector<48x128xbf16>, vector<16x128xf32> -> vector<16x128xf32>
    %c0_4 = arith.constant 0 : index
    %c0_5 = arith.constant 0 : index
    %7 = vector.load %arg9[%c0_4, %c0_5] : memref<1x128xf32, #tpu.memory_space<vmem>>, vector<1x128xf32>
    %8 = vector.broadcast %7 : vector<1x128xf32> to vector<16x128xf32>
    %9 = arith.addf %6, %8 : vector<16x128xf32>
    %c0_6 = arith.constant 0 : index
    %c0_7 = arith.constant 0 : index
    %10 = vector.load %arg10[%c0_6, %c0_7] : memref<16x128xf32, #tpu.memory_space<vmem>>, vector<16x128xf32>
    tpu.vector_store %arg10[%c0_6, %c0_7], %9 {strides = array<i32>} : memref<16x128xf32, #tpu.memory_space<vmem>>, vector<16x128xf32>,
    return
  }
  func.func @transform_0(%arg0: i32, %arg1: i32) -> (i32, i32) {
    %c0_i32 = arith.constant 0 : i32
    %c0_i32_0 = arith.constant 0 : i32
    return %arg0, %c0_i32 : i32, i32
  }
  func.func @transform_1(%arg0: i32, %arg1: i32) -> (i32, i32) {
    %c0_i32 = arith.constant 0 : i32
    %c0_i32_0 = arith.constant 0 : i32
    return %arg0, %c0_i32 : i32, i32
  }
  func.func @transform_2(%arg0: i32, %arg1: i32) -> (i32, i32) {
    %c0_i32 = arith.constant 0 : i32
    %c0_i32_0 = arith.constant 0 : i32
    %c0_i32_1 = arith.constant 0 : i32
    return %c0_i32, %c0_i32_0 : i32, i32
  }
  func.func @transform_3(%arg0: i32, %arg1: i32) -> (i32, i32) {
    %c0_i32 = arith.constant 0 : i32
    %c0_i32_0 = arith.constant 0 : i32
    %c0_i32_1 = arith.constant 0 : i32
    return %c0_i32, %c0_i32_0 : i32, i32
  }
  func.func @transform_4(%arg0: i32, %arg1: i32) -> (i32, i32) {
    %c0_i32 = arith.constant 0 : i32
    %c0_i32_0 = arith.constant 0 : i32
    %c0_i32_1 = arith.constant 0 : i32
    return %c0_i32, %c0_i32_0 : i32, i32
  }
  func.func @transform_5(%arg0: i32, %arg1: i32) -> (i32, i32) {
    %c0_i32 = arith.constant 0 : i32
    %c0_i32_0 = arith.constant 0 : i32
    %c0_i32_1 = arith.constant 0 : i32
    return %c0_i32, %c0_i32_0 : i32, i32
  }
  func.func @transform_6(%arg0: i32, %arg1: i32) -> (i32, i32) {
    %c0_i32 = arith.constant 0 : i32
    %c0_i32_0 = arith.constant 0 : i32
    return %c0_i32, %arg1 : i32, i32
  }
  func.func @transform_7(%arg0: i32, %arg1: i32) -> (i32, i32) {
    %c0_i32 = arith.constant 0 : i32
    %c0_i32_0 = arith.constant 0 : i32
    return %c0_i32, %arg1 : i32, i32
  }
  func.func @transform_8(%arg0: i32, %arg1: i32) -> (i32, i32) {
    %c0_i32 = arith.constant 0 : i32
    return %arg0, %arg1 : i32, i32
  }
}

</mosaic_0001>

<bundles_post_ra>
// kernel: tpu_custom_call.1
= control target key start
LH: loop header
LB: loop body
LE: loop exit
PB: predicated region body
PF: predicated region fallthrough
CT: control target
= control target key end

     0   :  { %13 = vsyncpa [#allocation4], 0  ;;  %s541_s0 = inlined_call_operand.hbm [shape: f32[16,32], index: 0, kind: input, shape index: {}]   ;;  %s542_s1 = inlined_call_operand.hbm [shape: f32[16,16], index: 1, kind: input, shape index: {}]   ;;  %s543_s2 = inlined_call_operand.vmem [shape: f32[1,32], index: 2, kind: input, shape index: {}]   ;;  %s544_s3 = inlined_call_operand.vmem [shape: f32[1,32], index: 3, kind: input, shape index: {}]   ;;  %s545_s4 = inlined_call_operand.vmem [shape: f32[1,16], index: 4, kind: input, shape index: {}]   ;;  %s546_s5 = inlined_call_operand.vmem [shape: f32[1,16], index: 5, kind: input, shape index: {}]   ;;  %s547_s6 = inlined_call_operand.hbm [shape: bf16[48,128], index: 6, kind: input, shape index: {}]   ;;  %s548_s7 = inlined_call_operand.vmem [shape: f32[1,128], index: 7, kind: input, shape index: {}]   ;;  %s549_s8 = inlined_call_operand.hbm [shape: f32[16,128], index: 8, kind: output, shape index: {}]  }
   0x1   :  { %14 = vsyncpa [#allocation7], 0 }
   0x2   :  { %15 = vsyncpa [#allocation5], 0  ;;  %s425_s27 = smov [#allocation6]   ;;  %s426_s29 = smov [#allocation3]  }
   0x3   :  { %s33_s28 = sshll.u32 %s425_s27, 4  ;;  %s21_s30 = sshll.u32 %s426_s29, 4  ;;  %s34_s28 = int_to_ptr.vmem [resolvable:$true] %s33_s28  ;;  %s22_s30 = int_to_ptr.vmem [resolvable:$true] %s21_s30 }
   0x4   :  { %s347_s9 = scalar_lea.vmem %s34_s28, 256  ;;  %p352_p1 = scmp.lt.s32.totalorder %s34_s28, %s34_s28 }
   0x5   :  { %p348_p0 = scmp.ne.s32.totalorder %s34_s28, %s347_s9  ;;  %p353_p2 = scmp.lt.s32.totalorder %s347_s9, %s347_s9 }
   0x7   :  { %p354_p3 = por %p353_p2, %p352_p1 }
   0x9   :  { %p355_p4 = pnand %p354_p3, %p348_p0 }
   0xb   :  { %358 = shalt.err (!%p355_p4)
}
   0xc   :  { %s427_s10 = smov 128   ;;  %s428_s11 = smov 8  }
   0xd   :  { %39 = dma.hbm_to_vmem [thread:$0]  %s542_s1, 256, %s34_s28, [#allocation7], %s427_s10, %s427_s10, %s428_s11  }
   0xe   :  { %s367_s14 = scalar_lea.vmem %s22_s30, 256  ;;  %p372_p6 = scmp.lt.s32.totalorder %s22_s30, %s22_s30 }
   0xf   :  { %p368_p5 = scmp.ne.s32.totalorder %s22_s30, %s367_s14  ;;  %p373_p7 = scmp.lt.s32.totalorder %s367_s14, %s367_s14 }
  0x11   :  { %p374_p8 = por %p373_p7, %p372_p6 }
  0x13   :  { %p375_p9 = pnand %p374_p8, %p368_p5 }
  0x15   :  { %378 = shalt.err (!%p375_p9)
}
  0x16   :  { %27 = dma.hbm_to_vmem [thread:$0]  %s541_s0, 256, %s22_s30, [#allocation4], %s427_s10, %s427_s10, %s428_s11  }
  0x17   :  { %s429_s17 = smov [#allocation8]  }
  0x18   :  { %s53_s18 = sshll.u32 %s429_s17, 4  ;;  %s54_s18 = int_to_ptr.vmem [resolvable:$true] %s53_s18 }
  0x19   :  { %s387_s19 = scalar_lea.vmem %s54_s18, 384  ;;  %p392_p11 = scmp.lt.s32.totalorder %s54_s18, %s54_s18 }
  0x1a   :  { %p388_p10 = scmp.ne.s32.totalorder %s54_s18, %s387_s19  ;;  %p393_p12 = scmp.lt.s32.totalorder %s387_s19, %s387_s19 }
  0x1c   :  { %p394_p13 = por %p393_p12, %p392_p11 }
  0x1e   :  { %p395_p0 = pnand %p394_p13, %p388_p10 }
  0x20   :  { %398 = shalt.err (!%p395_p0)
}
  0x21   :  { %s430_s1 = smov 64   ;;  %s431_s20 = smov 4  }
  0x22   :  { %59 = dma.hbm_to_vmem [thread:$0]  %s547_s6, 384, %s54_s18, [#allocation7], %s430_s1, %s430_s1, %s431_s20  }
  0x23   :  { %419 = dma.done.wait [#allocation4], 256  }
  0x24   :  { %420 = vsyncadd [#allocation4], 4294967040 }
  0x25   :  { %421 = dma.done.wait [#allocation7], 640  }
  0x26   :  { %422 = vsyncadd [#allocation7], 4294966656  ;;  %vm133_vm0 = vcmask 130048   ;;  %v129_v0 = vld [vmem:[#allocation6] sm:$0xff]  ;;  %v496_v1 = vld [vmem:[#allocation6 + $0x8] sm:$0xff]  ;;  %vm80_vm1 = vcmask 261120  }
  0x27   :  { %v134_v2 = vsel %vm133_vm0, %v129_v0, 0.0  ;;  %v140_v3 = vmul.f32 %v129_v0, %v129_v0  ;;  %v141_v4 = vmul.f32 %v496_v1, %v496_v1  ;;  %v137_v6 = vsel %vm133_vm0, %v496_v1, 0.0  ;;  %v501_v7 = vld [vmem:[#allocation3] sm:$0xff]  ;;  %v503_v9 = vld [vmem:[#allocation3 + $0x8] sm:$0xff]  ;;  %v328_v33 = vld [vmem:[#allocation8 + $0x10] sm:$0xff]   ;;  %s434_s25 = smov 32  }
  0x28   :  { %135 = vadd.xlane.f32.xlu0 %v134_v2  ;;  %v81_v10 = vsel %vm80_vm1, %v501_v7, 0.0  ;;  %v87_v11 = vmul.f32 %v501_v7, %v501_v7  ;;  %v84_v12 = vsel %vm80_vm1, %v503_v9, 0.0  ;;  %v88_v13 = vmul.f32 %v503_v9, %v503_v9  ;;  %v329_v34 = vld [vmem:[#allocation8 + $0x8] sm:$0xff]   ;;  %v296_v37 = vld [vmem:[%s545_s4] ss:$0 sm:$0xff]  ;;  %v330_v40 = vld [vmem:[#allocation8] sm:$0xff]  }
  0x29   :  { %v142_v5 = vsel %vm133_vm0, %v140_v3, 0.0  ;;  %v145_v8 = vsel %vm133_vm0, %v141_v4, 0.0  ;;  %v432_v32 = vmov 0.0   ;;  %vm433_vm2 = vmmov 0   ;;  %v297_v39 = vld [vmem:[%s546_s5] ss:$0 sm:$0xff] }
  0x2a   :  { %143 = vadd.xlane.f32.xlu1 %v142_v5  ;;  %v89_v14 = vsel %vm80_vm1, %v87_v11, 0.0  ;;  %v92_v15 = vsel %vm80_vm1, %v88_v13, 0.0  ;;  %307 = vmatprep.subr.bf16.mxu0 %v432_v32  ;;  %v294_v5 = vld [vmem:[%s543_s2] ss:$0 sm:$0xff]  ;;  %vm192_vm3 = vcmask 392192  }
  0x2b   :  { %308 = vmatpush3.bf16.msra.mxu0 %v328_v33  ;;  %313 = vmatprep.mubr.msk.bf16.mxu0 %vm433_vm2, %v432_v32 }
  0x2c   :  { %138 = vadd.xlane.f32.xlu0 %v137_v6  ;;  %309 = vmatprep.subr.bf16.mxu0 %v432_v32 }
  0x2e   :  { %146 = vadd.xlane.f32.xlu1 %v145_v8 }
  0x2f   :  { %310 = vmatpush3.bf16.msra.mxu0 %v329_v34 }
  0x30   :  { %82 = vadd.xlane.f32.xlu0 %v81_v10  ;;  %311 = vmatprep.subr.bf16.mxu0 %v432_v32  ;;  %v295_v10 = vld [vmem:[%s544_s3] ss:$0 sm:$0xff]  ;;  %s435_s3 = smov [#allocation9]  }
  0x31   :  { %s281_s29 = sshll.u32 %s435_s3, 4  ;;  %s282_s29 = int_to_ptr.vmem [resolvable:$true] %s281_s29 }
  0x32   :  { %85 = vadd.xlane.f32.xlu1 %v84_v12  ;;  %s399_s30 = scalar_lea.vmem %s282_s29, 256  ;;  %p404_p2 = scmp.lt.s32.totalorder %s282_s29, %s282_s29 }
  0x33   :  { %312 = vmatpush3.bf16.msra.mxu0 %v330_v40  ;;  %p400_p1 = scmp.ne.s32.totalorder %s282_s29, %s399_s30  ;;  %p405_p3 = scmp.lt.s32.totalorder %s399_s30, %s399_s30 }
  0x34   :  { %90 = vadd.xlane.f32.xlu0 %v89_v14 }
  0x35   :  { %p406_p4 = por %p405_p3, %p404_p2 }
  0x36   :  { %93 = vadd.xlane.f32.xlu1 %v92_v15 }
  0x37   :  { %p407_p5 = pnand %p406_p4, %p400_p1 }
  0xb1   :  { %v136_v16 = vpop.xlane.xlu0 %135 }
  0xb2   :  { %v148_v17 = vmul.f32 0.0625, %v136_v16 }
  0xb3   :  { %v144_v18 = vpop.xlane.xlu1 %143 }
  0xb4   :  { %v152_v19 = vmul.f32 %v148_v17, %v148_v17  ;;  %v150_v20 = vmul.f32 0.0625, %v144_v18  ;;  %v158_v35 = vsub.f32 %v129_v0, %v148_v17 }
  0xb5   :  { %v139_v21 = vpop.xlane.xlu0 %138 }
  0xb6   :  { %v154_v22 = vsub.f32 %v150_v20, %v152_v19  ;;  %v149_v23 = vmul.f32 0.0625, %v139_v21  ;;  %v298_v19 = vld [vmem:[%s548_s7] ss:$0 sm:$0xff] }
  0xb7   :  { %v147_v24 = vpop.xlane.xlu1 %146 }
  0xb8   :  { %v156_v25 = vmax.f32 %v154_v22, 0.0  ;;  %v153_v26 = vmul.f32 %v149_v23, %v149_v23  ;;  %v151_v27 = vmul.f32 0.0625, %v147_v24  ;;  %v159_v41 = vsub.f32 %v496_v1, %v149_v23 }
  0xb9   :  { %v83_v48 = vpop.xlane.xlu0 %82 }
  0xba   :  { %v160_v28 = vadd.f32 1e-05, %v156_v25  ;;  %v155_v29 = vsub.f32 %v151_v27, %v153_v26  ;;  %v95_v50 = vmul.f32 0.03125, %v83_v48 }
  0xbb   :  { %v86_v49 = vpop.xlane.xlu1 %85 }
  0xbc   :  { %331 = vrsqrt.f32 %v160_v28  ;;  %v157_v30 = vmax.f32 %v155_v29, 0.0  ;;  %v96_v52 = vmul.f32 0.03125, %v86_v49  ;;  %v99_v53 = vmul.f32 %v95_v50, %v95_v50 }
  0xbd   :  { %v91_v51 = vpop.xlane.xlu0 %90  ;;  %v105_v0 = vsub.f32 %v501_v7, %v95_v50 }
  0xbe   :  { %v161_v31 = vadd.f32 1e-05, %v157_v30  ;;  %v97_v54 = vmul.f32 0.03125, %v91_v51  ;;  %v100_v56 = vmul.f32 %v96_v52, %v96_v52  ;;  %v106_v2 = vsub.f32 %v503_v9, %v96_v52 }
  0xbf   :  { %v94_v55 = vpop.xlane.xlu1 %93 }
  0xc0   :  { %333 = vrsqrt.f32 %v161_v31  ;;  %v98_v57 = vmul.f32 0.03125, %v94_v55  ;;  %v101_v58 = vsub.f32 %v97_v54, %v99_v53 }
  0xc2   :  { %v102_v59 = vsub.f32 %v98_v57, %v100_v56  ;;  %v103_v60 = vmax.f32 %v101_v58, 0.0 }
  0xc4   :  { %v104_v61 = vmax.f32 %v102_v59, 0.0  ;;  %v107_v62 = vadd.f32 1e-05, %v103_v60 }
  0xc6   :  { %v108_v63 = vadd.f32 1e-05, %v104_v61  ;;  %335 = vrsqrt.f32 %v107_v62 }
  0xc8   :  { %337 = vrsqrt.f32 %v108_v63 }
  0xc9   :  { %v332_v36 = vpop.eup %331 }
  0xca   :  { %v164_v38 = vmul.f32 %v332_v36, %v158_v35 }
  0xcc   :  { %v172_v42 = vmul.f32 %v296_v37, %v164_v38 }
  0xcd   :  { %v334_v43 = vpop.eup %333 }
  0xce   :  { %v180_v44 = vadd.f32 %v297_v39, %v172_v42  ;;  %v165_v45 = vmul.f32 %v334_v43, %v159_v41 }
  0xd0   :  { %184 = vrot.lane.b32.xlu0 %v180_v44, %s434_s25  ;;  %v173_v46 = vmul.f32 %v296_v37, %v165_v45 }
  0xd2   :  { %v181_v47 = vadd.f32 %v297_v39, %v173_v46 }
  0xd3   :  { %v336_v1 = vpop.eup %335 }
  0xd4   :  { %186 = vrot.lane.b32.xlu1 %v181_v47, %s434_s25  ;;  %v111_v3 = vmul.f32 %v336_v1, %v105_v0 }
  0xd5   :  { %v338_v4 = vpop.eup %337 }
  0xd6   :  { %v119_v6 = vmul.f32 %v294_v5, %v111_v3  ;;  %v112_v8 = vmul.f32 %v338_v4, %v106_v2 }
  0xd8   :  { %v127_v11 = vadd.f32 %v295_v10, %v119_v6  ;;  %v120_v12 = vmul.f32 %v294_v5, %v112_v8 }
  0xda   :  { %v128_v9 = vadd.f32 %v295_v10, %v120_v12 }
 0x142   :  { %v185_v13 = vpop.permute.xlu0 %184 }
 0x143   :  { %v190_v7 = vsel %vm80_vm1, %v127_v11, %v185_v13 }
 0x144   :  { %193 = vst.msk [vmem:[#allocation2] sm:$0xff] %vm192_vm3, %v190_v7 }
 0x146   :  { %v187_v14 = vpop.permute.xlu1 %186 }
 0x147   :  { %v191_v15 = vsel %vm80_vm1, %v128_v9, %v187_v14 }
 0x148   :  { %194 = vst.msk [vmem:[#allocation2 + $0x8] sm:$0xff] %vm192_vm3, %v191_v15 }
 0x14b   :  { %v195_v16 = vld [vmem:[#allocation2] sm:$0xff] }
 0x14f   :  { %v196_v17 = vld [vmem:[#allocation2 + $0x8] sm:$0xff] }
 0x150   :  { %v197_v18 = vpack.c.bf16 %v196_v17, %v195_v16 }
 0x152   :  { %314 = vmatmul.mubr.msk.bf16.vlgmr.msra.gmra.mxu0 %vm192_vm3, %v197_v18 }
 0x212   :  { %v267_v20 = vpop.f32.mrf.mxu0 }
 0x213   :  { %v268_v21 = vadd.f32 %v298_v19, %v267_v20 }
 0x214   :  { %v315_v22 = vpop.f32.mrf.mxu0 }
 0x215   :  { %274 = vst [vmem:[#allocation9] sm:$0xff] %v268_v21 }
 0x216   :  { %v270_v23 = vpop.f32.mrf.mxu0 }
 0x217   :  { %v271_v24 = vadd.f32 %v298_v19, %v270_v23 }
 0x218   :  { %v316_v25 = vpop.f32.mrf.mxu0 }
 0x219   :  { %275 = vst [vmem:[#allocation9 + $0x8] sm:$0xff] %v271_v24 }
 0x21a   :  { %410 = shalt.err (!%p407_p5)
}
 0x21b   :  { %287 = dma.vmem_to_hbm [thread:$0]  %s282_s29, 256, %s549_s8, [#allocation5], %s427_s10, %s427_s10, %s428_s11  }
 0x21c   :  { %423 = dma.done.wait [#allocation5], 256  }
 0x21d   :  { %424 = vsyncadd [#allocation5], 4294967040 }
 0x21e   :  { %291 = vsyncpa [#allocation4], 1 }
 0x21f   :  { %292 = vsyncpa [#allocation7], 1 }
 0x220   :  { %293 = vsyncpa [#allocation5], 1 }

</bundles_post_ra>
